<compile_context>
chip_gen: v7x
topology: tpu7x:2x2x1
jax: 0.10.0
libtpu: 0.0.40
codegen_flags: <defaults>
</compile_context>

<pallas_src>
import jax
import jax.numpy as jnp
from jax.experimental import pallas as pl
from jax.experimental.pallas import tpu as pltpu

_LANES = 128


def _vmem_budget():
    """(block budget bytes, vmem_limit_bytes) chosen per TPU generation."""
    cap = None
    try:
        cap = getattr(pltpu.get_tpu_info(), "vmem_capacity_bytes", None)
    except Exception:
        cap = None
    if cap is None:
        cap = 64 * 1024 * 1024  # conservative (v7x-class)
    if cap >= 100 * 1024 * 1024:
        # v5e / v6e: 128 MiB physical VMEM -> big blocks, ~85% of HBM roofline.
        return 72 * 1024 * 1024, 96 * 1024 * 1024
    # v7x-class: 64 MiB physical (32 MiB scoped default) -> tighter budget.
    budget = 28 * 1024 * 1024
    limit = min(cap - 12 * 1024 * 1024, 44 * 1024 * 1024)
    return budget, max(limit, budget + 8 * 1024 * 1024)


def _pick_tile_rows(n_rows, in_item, tg_item, budget):
    """Tile height over the lane-dense row axis.

    Returns (tile_rows, padded_rows).  tile_rows is either the full row count
    or a multiple of 8; padded_rows is a multiple of tile_rows (zero padding
    is exact for these sums).
    """
    # Double-buffered (1, 2, tile_rows, 128) input + target blocks.
    per_row = 2 * 2 * _LANES * (in_item + tg_item)
    reserve = 256 * 1024  # accumulators, output block, internal scratch
    max_rows = max(8, ((budget - reserve) // per_row // 8) * 8)

    if n_rows <= max_rows:
        return n_rows, n_rows  # single full-extent block (need not be /8)

    for cand in range((max_rows // 8) * 8, 0, -8):  # largest divisor, no pad
        if n_rows % cand == 0:
            return cand, n_rows

    tile = (max_rows // 8) * 8  # no divisor fits: pad rows up (exact)
    return tile, pl.cdiv(n_rows, tile) * tile


def tversky_loss(inputs, targets, smooth=1, alpha=0.2, beta=0.8):
    """inputs, targets: (B, C, H, W), channel 0 = negative, channel 1 = positive."""
    B, C, H, W = inputs.shape
    assert C >= 2, "TverskyLoss expects at least 2 channels (neg, pos)"
    assert targets.shape[0] == B and targets.shape[2:] == (H, W)
    alpha = float(alpha)
    beta = float(beta)

    in_item = jnp.dtype(inputs.dtype).itemsize
    tg_item = jnp.dtype(targets.dtype).itemsize
    budget, vmem_limit = _vmem_budget()

    flat = H * W
    rows0 = pl.cdiv(flat, _LANES)                      # lane-dense rows (pre-pad)
    tile_rows, rows = _pick_tile_rows(rows0, in_item, tg_item, budget)
    flat_pad = rows * _LANES
    n_tiles = rows // tile_rows

    def to_lane_dense(x):
        if flat_pad == flat:
            # Pure view over contiguous trailing dims; keep all C channels and
            # let the BlockSpec pick channels 0..1 (no wrapper-side HBM pass).
            return x.reshape(B, x.shape[1], rows, _LANES)
        x2 = x[:, :2].reshape(B, 2, flat)
        x2 = jnp.pad(x2, ((0, 0), (0, 0), (0, flat_pad - flat)))
        return x2.reshape(B, 2, rows, _LANES)

    inp = to_lane_dense(inputs)
    tgt = to_lane_dense(targets)

    # Megacore: when B is odd (esp. B == 1), split the row-tile axis in two so
    # both v7x TensorCores get work.  No-op / single split otherwise.
    n_split = 2 if (B % 2 == 1 and n_tiles % 2 == 0 and n_tiles >= 2) else 1
    n_inner = n_tiles // n_split

    def kernel(in_ref, tg_ref, out_ref, acc_tp, acc_fpfn):
        h = pl.program_id(2)
        n_h = pl.num_programs(2)

        # Block is (1, 2, tile_rows, 128): channel 0 = neg, channel 1 = pos.
        inN = in_ref[0, 0].astype(jnp.float32)
        inP = in_ref[0, 1].astype(jnp.float32)
        tN = tg_ref[0, 0].astype(jnp.float32)
        tP = tg_ref[0, 1].astype(jnp.float32)

        # Per-step sublane reduce (XLU) -> tiny (1, 128) partials.
        tp_part = jnp.sum(inP * tP, axis=0, keepdims=True)
        fpfn_part = jnp.sum(alpha * (inP * tN) + beta * (tP * inN),
                            axis=0, keepdims=True)

        @pl.when(h == 0)
        def _init():
            acc_tp[...] = tp_part
            acc_fpfn[...] = fpfn_part

        @pl.when(h != 0)
        def _accum():
            acc_tp[...] += tp_part
            acc_fpfn[...] += fpfn_part

        @pl.when(h == n_h - 1)
        def _finalize():
            tp = jnp.sum(acc_tp[...])
            fpfn = jnp.sum(acc_fpfn[...])
            # Unmasked lane-dense store of the (1, 1, 2, 128) output block:
            # row 0 = TP, row 1 = alpha*FP + beta*FN (broadcast across lanes).
            rid = jax.lax.broadcasted_iota(jnp.int32, (1, 1, 2, _LANES), 2)
            out_ref[...] = jnp.where(rid == 0, tp, fpfn)

    in_spec = pl.BlockSpec((1, 2, tile_rows, _LANES),
                           lambda b, s, h: (b, 0, s * n_inner + h, 0))
    tg_spec = pl.BlockSpec((1, 2, tile_rows, _LANES),
                           lambda b, s, h: (b, 0, s * n_inner + h, 0))
    out_spec = pl.BlockSpec((1, 1, 2, _LANES), lambda b, s, h: (b, s, 0, 0))

    cost = pl.CostEstimate(
        flops=8 * B * flat_pad,
        transcendentals=0,
        bytes_accessed=2 * B * flat_pad * (in_item + tg_item)
        + B * n_split * 2 * _LANES * 4,
    )

    partials = pl.pallas_call(
        kernel,
        out_shape=jax.ShapeDtypeStruct((B, n_split, 2, _LANES), jnp.float32),
        grid_spec=pltpu.PrefetchScalarGridSpec(
            num_scalar_prefetch=0,
            grid=(B, n_split, n_inner),
            in_specs=[in_spec, tg_spec],
            out_specs=out_spec,
            scratch_shapes=[
                pltpu.VMEM((1, _LANES), jnp.float32),
                pltpu.VMEM((1, _LANES), jnp.float32),
            ],
        ),
        compiler_params=pltpu.CompilerParams(
            dimension_semantics=("parallel", "parallel", "arbitrary"),
            vmem_limit_bytes=vmem_limit,
        ),
        cost_estimate=cost,
    )(inp, tgt)

    # Combine per-(batch, split) partials (lane 0 holds the scalar) + final math.
    sums = jnp.sum(partials[..., 0], axis=(0, 1))     # (2,) = [TP, a*FP + b*FN]
    tp, fpfn = sums[0], sums[1]
    tversky = (tp + smooth) / (tp + fpfn + smooth)
    return 1.0 - tversky


def tversky_loss_ref(inputs, targets, smooth=1, alpha=0.2, beta=0.8):
    inputsN = inputs[:, 0, :, :].astype(jnp.float32).reshape(-1)
    targetsN = targets[:, 0, :, :].astype(jnp.float32).reshape(-1)
    inputsP = inputs[:, 1, :, :].astype(jnp.float32).reshape(-1)
    targetsP = targets[:, 1, :, :].astype(jnp.float32).reshape(-1)
    TP = (inputsP * targetsP).sum()
    FP = (inputsP * targetsN).sum()
    FN = (targetsP * inputsN).sum()
    tversky = (TP + smooth) / (TP + alpha * FP + beta * FN + smooth)
    return 1.0 - tversky


if __name__ == "__main__":
    key = jax.random.PRNGKey(0)
    k1, k2 = jax.random.split(key)

    B, C, H, W = 2, 4, 16, 16  # NCHW; channel 0 = negative, channel 1 = positive

    # Softmax-like probabilities for "inputs" (f32); one-hot targets in bf16
    # (exact 0/1) exercise the narrow-dtype read path.  bf16 inputs are also
    # supported and recommended when the caller tolerates it (HBM-bound).
    logits = jax.random.normal(k1, (B, C, H, W), dtype=jnp.float32)
    inputs = jax.nn.softmax(logits, axis=1)
    labels = jax.random.randint(k2, (B, H, W), 0, C)
    targets = jax.nn.one_hot(labels, C, axis=1, dtype=jnp.bfloat16)

    loss = jax.block_until_ready(tversky_loss(inputs, targets))
    ref = jax.block_until_ready(tversky_loss_ref(inputs, targets))

    assert jnp.allclose(loss, ref, rtol=1e-5, atol=1e-5), (loss, ref)
    print("KERNEL_OK")
</pallas_src>

<mosaic_0001>
module attributes {stable_mosaic.version = 11 : i64} {
  func.func @kernel(%arg0: i32, %arg1: i32, %arg2: i32, %arg3: memref<1x2x2x128xf32, #tpu.memory_space<vmem>>, %arg4: memref<1x2x2x128xbf16, #tpu.memory_space<vmem>>, %arg5: memref<1x1x2x128xf32, #tpu.memory_space<vmem>>, %arg6: memref<1x128xf32, #tpu.memory_space<vmem>>, %arg7: memref<1x128xf32, #tpu.memory_space<vmem>>) attributes {dimension_semantics = [#tpu.dimension_semantics<parallel>, #tpu.dimension_semantics<parallel>, #tpu.dimension_semantics<arbitrary>], iteration_bounds = array<i64: 2, 1, 1>, scalar_prefetch = 0 : i64, scratch_operands = 2 : i64, tpu.core_type = #tpu.core_type<tc>, window_params = [{transform_indices = @transform_0, window_bounds = array<i64: 1, 2, 2, 128>}, {transform_indices = @transform_1, window_bounds = array<i64: 1, 2, 2, 128>}, {transform_indices = @transform_2, window_bounds = array<i64: 1, 1, 2, 128>}]} {
    %c0 = arith.constant 0 : index
    %c0_0 = arith.constant 0 : index
    %c0_1 = arith.constant 0 : index
    %c0_2 = arith.constant 0 : index
    %0 = vector.load %arg3[%c0, %c0_0, %c0_1, %c0_2] : memref<1x2x2x128xf32, #tpu.memory_space<vmem>>, vector<1x1x2x128xf32>
    %1 = vector.shape_cast %0 : vector<1x1x2x128xf32> to vector<2x128xf32>
    %c0_3 = arith.constant 0 : index
    %c1 = arith.constant 1 : index
    %c0_4 = arith.constant 0 : index
    %c0_5 = arith.constant 0 : index
    %2 = vector.load %arg3[%c0_3, %c1, %c0_4, %c0_5] : memref<1x2x2x128xf32, #tpu.memory_space<vmem>>, vector<1x1x2x128xf32>
    %3 = vector.shape_cast %2 : vector<1x1x2x128xf32> to vector<2x128xf32>
    %c0_6 = arith.constant 0 : index
    %c0_7 = arith.constant 0 : index
    %c0_8 = arith.constant 0 : index
    %c0_9 = arith.constant 0 : index
    %4 = vector.load %arg4[%c0_6, %c0_7, %c0_8, %c0_9] : memref<1x2x2x128xbf16, #tpu.memory_space<vmem>>, vector<1x1x2x128xbf16>
    %5 = vector.shape_cast %4 : vector<1x1x2x128xbf16> to vector<2x128xbf16>
    %6 = arith.extf %5 : vector<2x128xbf16> to vector<2x128xf32>
    %c0_10 = arith.constant 0 : index
    %c1_11 = arith.constant 1 : index
    %c0_12 = arith.constant 0 : index
    %c0_13 = arith.constant 0 : index
    %7 = vector.load %arg4[%c0_10, %c1_11, %c0_12, %c0_13] : memref<1x2x2x128xbf16, #tpu.memory_space<vmem>>, vector<1x1x2x128xbf16>
    %8 = vector.shape_cast %7 : vector<1x1x2x128xbf16> to vector<2x128xbf16>
    %9 = arith.extf %8 : vector<2x128xbf16> to vector<2x128xf32>
    %10 = arith.mulf %3, %9 : vector<2x128xf32>
    %cst = arith.constant dense<0.000000e+00> : vector<128xf32>
    %11 = vector.multi_reduction <add>, %10, %cst [0] : vector<2x128xf32> to vector<128xf32>
    %12 = vector.shape_cast %11 : vector<128xf32> to vector<1x128xf32>
    %13 = arith.mulf %3, %6 : vector<2x128xf32>
    %cst_14 = arith.constant 2.000000e-01 : f32
    %14 = vector.broadcast %cst_14 : f32 to vector<2x128xf32>
    %15 = arith.mulf %14, %13 : vector<2x128xf32>
    %16 = arith.mulf %9, %1 : vector<2x128xf32>
    %cst_15 = arith.constant 8.000000e-01 : f32
    %17 = vector.broadcast %cst_15 : f32 to vector<2x128xf32>
    %18 = arith.mulf %17, %16 : vector<2x128xf32>
    %19 = arith.addf %15, %18 : vector<2x128xf32>
    %cst_16 = arith.constant dense<0.000000e+00> : vector<128xf32>
    %20 = vector.multi_reduction <add>, %19, %cst_16 [0] : vector<2x128xf32> to vector<128xf32>
    %21 = vector.shape_cast %20 : vector<128xf32> to vector<1x128xf32>
    %c0_i32 = arith.constant 0 : i32
    %22 = arith.cmpi eq, %arg2, %c0_i32 : i32
    %23 = arith.extui %22 : i1 to i32
    %c0_i32_17 = arith.constant 0 : i32
    %24 = arith.cmpi ne, %23, %c0_i32_17 : i32
    scf.if %24 {
      %c0_22 = arith.constant 0 : index
      %c0_23 = arith.constant 0 : index
      %31 = vector.load %arg6[%c0_22, %c0_23] : memref<1x128xf32, #tpu.memory_space<vmem>>, vector<1x128xf32>
      tpu.vector_store %arg6[%c0_22, %c0_23], %12 {strides = array<i32>} : memref<1x128xf32, #tpu.memory_space<vmem>>, vector<1x128xf32>,
      %c0_24 = arith.constant 0 : index
      %c0_25 = arith.constant 0 : index
      %32 = vector.load %arg7[%c0_24, %c0_25] : memref<1x128xf32, #tpu.memory_space<vmem>>, vector<1x128xf32>
      tpu.vector_store %arg7[%c0_24, %c0_25], %21 {strides = array<i32>} : memref<1x128xf32, #tpu.memory_space<vmem>>, vector<1x128xf32>,
    } else {
    }
    %c0_i32_18 = arith.constant 0 : i32
    %25 = arith.cmpi ne, %arg2, %c0_i32_18 : i32
    %26 = arith.extui %25 : i1 to i32
    %c0_i32_19 = arith.constant 0 : i32
    %27 = arith.cmpi ne, %26, %c0_i32_19 : i32
    scf.if %27 {
      %c0_22 = arith.constant 0 : index
      %c0_23 = arith.constant 0 : index
      %31 = vector.load %arg6[%c0_22, %c0_23] : memref<1x128xf32, #tpu.memory_space<vmem>>, vector<1x128xf32>
      %32 = arith.addf %31, %12 : vector<1x128xf32>
      %c0_24 = arith.constant 0 : index
      %c0_25 = arith.constant 0 : index
      %33 = vector.load %arg6[%c0_24, %c0_25] : memref<1x128xf32, #tpu.memory_space<vmem>>, vector<1x128xf32>
      tpu.vector_store %arg6[%c0_24, %c0_25], %32 {strides = array<i32>} : memref<1x128xf32, #tpu.memory_space<vmem>>, vector<1x128xf32>,
      %c0_26 = arith.constant 0 : index
      %c0_27 = arith.constant 0 : index
      %34 = vector.load %arg7[%c0_26, %c0_27] : memref<1x128xf32, #tpu.memory_space<vmem>>, vector<1x128xf32>
      %35 = arith.addf %34, %21 : vector<1x128xf32>
      %c0_28 = arith.constant 0 : index
      %c0_29 = arith.constant 0 : index
      %36 = vector.load %arg7[%c0_28, %c0_29] : memref<1x128xf32, #tpu.memory_space<vmem>>, vector<1x128xf32>
      tpu.vector_store %arg7[%c0_28, %c0_29], %35 {strides = array<i32>} : memref<1x128xf32, #tpu.memory_space<vmem>>, vector<1x128xf32>,
    } else {
    }
    %c0_i32_20 = arith.constant 0 : i32
    %28 = arith.cmpi eq, %arg2, %c0_i32_20 : i32
    %29 = arith.extui %28 : i1 to i32
    %c0_i32_21 = arith.constant 0 : i32
    %30 = arith.cmpi ne, %29, %c0_i32_21 : i32
    scf.if %30 {
      %c0_22 = arith.constant 0 : index
      %c0_23 = arith.constant 0 : index
      %31 = vector.load %arg6[%c0_22, %c0_23] : memref<1x128xf32, #tpu.memory_space<vmem>>, vector<1x128xf32>
      %32 = vector.shape_cast %31 : vector<1x128xf32> to vector<1x1x128xf32>
      %cst_24 = arith.constant dense<0.000000e+00> : vector<1xf32>
      %33 = vector.multi_reduction <add>, %32, %cst_24 [1, 2] : vector<1x1x128xf32> to vector<1xf32>
      %34 = vector.shape_cast %33 : vector<1xf32> to vector<1x1x1xf32>
      %35 = vector.extract %34[0, 0, 0] : f32 from vector<1x1x1xf32>
      %c0_25 = arith.constant 0 : index
      %c0_26 = arith.constant 0 : index
      %36 = vector.load %arg7[%c0_25, %c0_26] : memref<1x128xf32, #tpu.memory_space<vmem>>, vector<1x128xf32>
      %37 = vector.shape_cast %36 : vector<1x128xf32> to vector<1x1x128xf32>
      %cst_27 = arith.constant dense<0.000000e+00> : vector<1xf32>
      %38 = vector.multi_reduction <add>, %37, %cst_27 [1, 2] : vector<1x1x128xf32> to vector<1xf32>
      %39 = vector.shape_cast %38 : vector<1xf32> to vector<1x1x1xf32>
      %40 = vector.extract %39[0, 0, 0] : f32 from vector<1x1x1xf32>
      %41 = tpu.iota {dimensions = array<i32: 2>} : vector<1x1x2x128xi32>
      %c0_i32_28 = arith.constant 0 : i32
      %42 = vector.broadcast %c0_i32_28 : i32 to vector<1x1x2x128xi32>
      %43 = arith.cmpi eq, %41, %42 : vector<1x1x2x128xi32>
      %44 = vector.broadcast %35 : f32 to vector<1x1x2x128xf32>
      %45 = vector.broadcast %40 : f32 to vector<1x1x2x128xf32>
      %46 = arith.select %43, %44, %45 : vector<1x1x2x128xi1>, vector<1x1x2x128xf32>
      %c0_29 = arith.constant 0 : index
      %c0_30 = arith.constant 0 : index
      %c0_31 = arith.constant 0 : index
      %c0_32 = arith.constant 0 : index
      %47 = vector.load %arg5[%c0_29, %c0_30, %c0_31, %c0_32] : memref<1x1x2x128xf32, #tpu.memory_space<vmem>>, vector<1x1x2x128xf32>
      tpu.vector_store %arg5[%c0_29, %c0_30, %c0_31, %c0_32], %46 {strides = array<i32>} : memref<1x1x2x128xf32, #tpu.memory_space<vmem>>, vector<1x1x2x128xf32>,
    } else {
    }
    return
  }
  func.func @transform_0(%arg0: i32, %arg1: i32, %arg2: i32) -> (i32, i32, i32, i32) {
    %c1_i32 = arith.constant 1 : i32
    %0 = arith.muli %arg1, %c1_i32 : i32
    %1 = arith.addi %0, %arg2 : i32
    %c0_i32 = arith.constant 0 : i32
    %c0_i32_0 = arith.constant 0 : i32
    %c0_i32_1 = arith.constant 0 : i32
    return %arg0, %c0_i32, %1, %c0_i32_0 : i32, i32, i32, i32
  }
  func.func @transform_1(%arg0: i32, %arg1: i32, %arg2: i32) -> (i32, i32, i32, i32) {
    %c1_i32 = arith.constant 1 : i32
    %0 = arith.muli %arg1, %c1_i32 : i32
    %1 = arith.addi %0, %arg2 : i32
    %c0_i32 = arith.constant 0 : i32
    %c0_i32_0 = arith.constant 0 : i32
    %c0_i32_1 = arith.constant 0 : i32
    return %arg0, %c0_i32, %1, %c0_i32_0 : i32, i32, i32, i32
  }
  func.func @transform_2(%arg0: i32, %arg1: i32, %arg2: i32) -> (i32, i32, i32, i32) {
    %c0_i32 = arith.constant 0 : i32
    %c0_i32_0 = arith.constant 0 : i32
    %c0_i32_1 = arith.constant 0 : i32
    return %arg0, %arg1, %c0_i32, %c0_i32_0 : i32, i32, i32, i32
  }
}

</mosaic_0001>

<bundles_post_ra>
// kernel: tpu_custom_call.1
= control target key start
LH: loop header
LB: loop body
LE: loop exit
PB: predicated region body
PF: predicated region fallthrough
CT: control target
= control target key end

     0   :  { %7 = vsyncpa [#allocation5], 0  ;;  %s935_s0 = inlined_call_operand.hbm [shape: f32[2,4,2,128], index: 0, kind: input, shape index: {}]   ;;  %s936_s1 = inlined_call_operand.hbm [shape: bf16[2,4,2,128], index: 1, kind: input, shape index: {}]   ;;  %s937_s2 = inlined_call_operand.hbm [shape: f32[2,1,2,128], index: 2, kind: output, shape index: {}]  }
   0x1   :  { %9 = vsyncpa [#allocation5 + $0x1], 0 }
   0x2   :  { %10 = vsyncpa [#allocation8], 0 }
   0x3   :  { %12 = vsyncpa [#allocation8 + $0x1], 0 }
   0x4   :  { %13 = vsyncpa [#allocation6], 0 }
   0x5   :  { %15 = vsyncpa [#allocation6 + $0x1], 0  ;;  %s708_s9 = smov 0   ;;  %s710_s10 = smov 0  }
   0x6   :  { %s712_s11 = smov 0   ;;  %s714_s12 = smov 0  }
   0x7   :  { %s716_s13 = smov 0   ;;  %s718_s14 = smov 0  }
   0x8 LB: > { %s441_s15 = sadd.s32 4294967295, %s684_s14   ;;  %s442_s16 = sadd.s32 4294967294, %s684_s14   ;;  %s684_s14 = sphi %s718_s14, %s21_s14   ;;  %s680_s13 = sphi %s716_s13, %s955_s13   ;;  %s676_s12 = sphi %s714_s12, %s954_s12   ;;  %s672_s11 = sphi %s712_s11, %s953_s11   ;;  %s668_s10 = sphi %s710_s10, %s952_s10   ;;  %s664_s9 = sphi %s708_s9, %s951_s9  }
   0x9   : > { %s40_s17 = sadd.s32 1, %s680_s13  ;;  %s51_s18 = sadd.s32 1, %s672_s11 }
   0xa   : > { %p42_p0 = scmp.ge.s32.totalorder %s40_s17, 2  ;;  %p58_p1 = scmp.ne.s32.totalorder %s672_s11, %s668_s10 }
   0xb   : > { %p59_p2 = scmp.eq.s32.totalorder %s684_s14, 0  ;;  %p64_p3 = scmp.ne.s32.totalorder %s668_s10, %s664_s9 }
   0xc   : > { %s957_s17 = smov (%p42_p0, %s40_s17), 0  ;;  %p65_p5 = scmp.eq.s32.totalorder %s441_s15, 0 }
   0xd   : > { %p749_p4 = por %p59_p2, %p58_p1  ;;  %s46_s20 = ssub.s32 %s680_s13, %s957_s17 }
   0xe   : > { %p120_p6 = scmp.eq.s32.totalorder %s441_s15, 1  ;;  %p49_p7 = scmp.eq.s32.totalorder %s46_s20, 0 }
   0xf   : > { %p755_p8 = por %p65_p5, %p64_p3  ;;  %p126_p10 = scmp.eq.s32.totalorder %s442_s16, 1 }
  0x10   : > { %p759_p9 = por %p120_p6, %p58_p1  ;;  %p484_p13 = scmp.lt.s32.totalorder %s684_s14, 2 }
  0x11   : > { %s941_s21 = scalar_select %p755_p8, 1, 0 }
  0x12   : > { %s942_s22 = scalar_select %p759_p9, 1, 0 }
  0x13   : > { %s764_s23 = scalar_select %p49_p7, %s672_s11, %s51_s18  }
  0x14   : > { %p766_p11 = por %p126_p10, %p64_p3  ;;  %s773_s25 = sand.u32 1, %s672_s11  }
  0x15   : > { %s445_s26 = sshll.u32 %s773_s25, 2  ;;  %s461_s27 = sshll.u32 %s680_s13, 7 }
  0x16   : > { %s943_s24 = scalar_select %p766_p11, 1, 0 }
  0x17   : > { %s780_s30 = scalar_lea.hbm %s935_s0, %s461_s27  ;;  %s150_s3 = scalar_lea.vmem [#allocation4], %s445_s26 }
  0x18   : > { %s159_s4 = sshll.u32 %s150_s3, 4  ;;  %p786_p0 = pnand %p484_p13, %p749_p4  ;;  %s782_s4 = int_to_ptr.vmem [resolvable:$true] %s159_s4 }
  0x19   : > { %s147_s6 = scalar_lea.sflag [#allocation5], %s773_s25  ;;  %s538_s7 = scalar_lea.hbm %s780_s30, 64 }
  0x1a   : > { %p539_p2 = scmp.ne.s32.totalorder %s780_s30, %s538_s7  ;;  %p540_p3 = pneg %p786_p0 }
  0x1b   : > { %s543_s16 = scalar_lea.hbm %s935_s0, 256  ;;  %p544_p4 = scmp.lt.u32.totalorder %s780_s30, %s935_s0 }
  0x1c   : > { %p541_p5 = pnand %p540_p3, %p539_p2  ;;  %p545_p7 = scmp.lt.u32.totalorder %s543_s16, %s538_s7 }
  0x1d   : > { %p547_p13 = scmp.lt.u32.totalorder %s538_s7, %s780_s30 }
  0x1e   : > { %p542_p6 = pneg %p541_p5  ;;  %p546_p10 = por %p545_p7, %p544_p4 }
  0x20   : > { %p548_p12 = por %p547_p13, %p546_p10 }
  0x22   : > { %p549_p1 = pnand %p548_p12, %p542_p6 }
  0x24   : > { %552 = shalt.err (!%p549_p1)
}
  0x25   : > { %s553_s20 = scalar_lea.vmem %s782_s4, 64  ;;  %s686_s26 = smov [#allocation4]  }
  0x26   : > { %p554_p2 = scmp.ne.s32.totalorder %s782_s4, %s553_s20  ;;  %s558_s27 = sshll.u32 %s686_s26, 4  ;;  %s559_s27 = int_to_ptr.vmem [resolvable:$false] %s558_s27 }
  0x27   : > { %s560_s28 = scalar_lea.vmem %s559_s27, 128  ;;  %p561_p9 = scmp.lt.s32.totalorder %s782_s4, %s559_s27 }
  0x28   : > { %p556_p5 = pnand %p554_p2, %p540_p3  ;;  %p562_p4 = scmp.lt.s32.totalorder %s560_s28, %s553_s20 }
  0x2a   : > { %p557_p11 = pneg %p556_p5  ;;  %p563_p7 = por %p562_p4, %p561_p9 }
  0x2c   : > { %p564_p10 = pnand %p563_p7, %p557_p11 }
  0x2e   : > { %567 = shalt.err (!%p564_p10)
}
  0x2f   : > { %s687_s29 = smov 32   ;;  %s688_s3 = smov 2  }
  0x30   : > { %476 = dma.hbm_to_vmem [thread:$0]  (!%p786_p0), %s780_s30, 64, %s782_s4, %s147_s6, %s687_s29, %s687_s29, %s688_s3  }
  0x31   : > { %p190_p12 = scmp.lt.s32.totalorder %s684_s14, 3  ;;  %s448_s7 = sshll.u32 %s773_s25, 1 }
  0x32   : > { %s462_s8 = sshll.u32 %s680_s13, 6  ;;  %p945_p9 = scmp.ge.s32.totalorder %s684_s14, 1 }
  0x33   : > { %s831_s19 = scalar_lea.hbm %s936_s1, %s462_s8  ;;  %s173_s20 = scalar_lea.vmem [#allocation7], %s448_s7 }
  0x34   : > { %p824_p11 = pnand %p945_p9, %p190_p12  ;;  %s182_s26 = sshll.u32 %s173_s20, 4  ;;  %s833_s26 = int_to_ptr.vmem [resolvable:$true] %s182_s26 }
  0x35   : > { %s170_s30 = scalar_lea.sflag [#allocation8], %s773_s25  ;;  %s568_s4 = scalar_lea.hbm %s831_s19, 32 }
  0x36   : > { %p569_p1 = scmp.ne.s32.totalorder %s831_s19, %s568_s4  ;;  %s573_s28 = scalar_lea.hbm %s936_s1, 128 }
  0x37   : > { %p574_p2 = scmp.lt.u32.totalorder %s831_s19, %s936_s1  ;;  %p575_p5 = scmp.lt.u32.totalorder %s573_s28, %s568_s4 }
  0x38   : > { %p571_p6 = pnand %p569_p1, %p540_p3  ;;  %p577_p7 = scmp.lt.u32.totalorder %s568_s4, %s831_s19 }
  0x39   : > { %p576_p4 = por %p575_p5, %p574_p2 }
  0x3a   : > { %p572_p13 = pneg %p571_p6 }
  0x3b   : > { %p578_p10 = por %p577_p7, %p576_p4 }
  0x3d   : > { %p579_p12 = pnand %p578_p10, %p572_p13 }
  0x3f   : > { %582 = shalt.err (!%p579_p12)
}
  0x40   : > { %s583_s7 = scalar_lea.vmem %s833_s26, 32  ;;  %s689_s8 = smov [#allocation7]  }
  0x41   : > { %p584_p9 = scmp.ne.s32.totalorder %s833_s26, %s583_s7  ;;  %s588_s16 = sshll.u32 %s689_s8, 4  ;;  %s589_s16 = int_to_ptr.vmem [resolvable:$false] %s588_s16 }
  0x42   : > { %s590_s18 = scalar_lea.vmem %s589_s16, 64  ;;  %p591_p8 = scmp.lt.s32.totalorder %s833_s26, %s589_s16 }
  0x43   : > { %p586_p1 = pnand %p584_p9, %p540_p3  ;;  %p592_p2 = scmp.lt.s32.totalorder %s590_s18, %s583_s7 }
  0x45   : > { %p587_p6 = pneg %p586_p1  ;;  %p593_p5 = por %p592_p2, %p591_p8 }
  0x47   : > { %p594_p4 = pnand %p593_p5, %p587_p6 }
  0x49   : > { %597 = shalt.err (!%p594_p4)
}
  0x4a   : > { %s690_s20 = smov 16   ;;  %s691_s4 = smov 1  }
  0x4b   : > { %479 = dma.hbm_to_vmem [thread:$0]  (!%p786_p0), %s831_s19, 32, %s833_s26, %s170_s30, %s690_s20, %s690_s20, %s691_s4  }
  0x4c   : > { %194 = sbr.rel (%p824_p11) target bundleno = 339 (0x153), region = 28  ;;  %s864_s6 = sand.u32 (!%p824_p11), 1, %s668_s10  }
  0x4d   : > { %s452_s27 = sshll.u32 (!%p824_p11), %s864_s6, 2  ;;  %s197_s28 = scalar_lea.sflag (!%p824_p11), [#allocation5], %s864_s6 }
  0x4e   : > { %s200_s29 = scalar_lea.vmem (!%p824_p11), [#allocation4], %s452_s27  ;;  %p947_p8 = scmp.ne.s32.totalorder (!%p824_p11), %s941_s21, 0 }
  0x53   : > { %651 = dma.done.wait (%p947_p8), %s197_s28, 64  }
  0x54   : > { %653 = vsyncadd (%p947_p8), %s197_s28, 4294967232  ;;  %s453_s25 = sshll.u32 %s864_s6, 1  ;;  %s206_s5 = scalar_lea.sflag [#allocation8], %s864_s6 }
  0x55   : > { %s209_s15 = scalar_lea.vmem [#allocation7], %s453_s25 }
  0x56   : > { %655 = dma.done.wait (%p947_p8), %s206_s5, 32  }
  0x57   : > { %657 = vsyncadd (%p947_p8), %s206_s5, 4294967264  ;;  %v455_v0 = vld [vmem:[%s200_s29 + $0x2] sm:$0x3]  ;;  %v240_v1 = vld [vmem:[%s209_s15] sm:$0x1]  ;;  %vm246_vm0 = vcmask 1041408   ;;  %v308_v44 = vlaneseq }
  0x58   : > { %v237_v2 = vld [vmem:[%s200_s29] sm:$0x3]  ;;  %v241_v3 = vunpack.c.l.bf16 %v240_v1  ;;  %v456_v4 = vld [vmem:[%s209_s15 + $0x1] sm:$0x1]  ;;  %vm286_vm1 = vcmask 1040384   ;;  %s458_s21 = sshll.u32 %s676_s12, 5 }
  0x59   : > { %v244_v5 = vunpack.c.l.bf16 %v456_v4  ;;  %v309_v45 = vshrl.u32 %v308_v44, 7  ;;  %s234_s26 = scalar_lea.vmem [#allocation9], %s453_s25  ;;  %s886_s16 = scalar_lea.hbm %s937_s2, %s458_s21 }
  0x5a   : > { %v254_v6 = vmul.f32 %v455_v0, %v241_v3  ;;  %s330_s30 = sshll.u32 %s234_s26, 4  ;;  %s316_s12 = scalar_lea.sflag [#allocation6], %s864_s6  ;;  %s888_s30 = int_to_ptr.vmem [resolvable:$true] %s330_s30 }
  0x5b   : > { %v245_v7 = vmul.f32 %v455_v0, %v244_v5  ;;  %v256_v8 = vmul.f32 %v244_v5, %v237_v2  ;;  %vm310_vm2 = vcmp.eq.s32.totalorder %v309_v45, 0  ;;  %s598_s18 = scalar_lea.vmem %s888_s30, 32  ;;  %p948_p3 = scmp.ne.s32.totalorder %s942_s22, 0 }
  0x5c   : > { %v255_v9 = vmul.f32 0.2, %v254_v6  ;;  %p599_p0 = scmp.ne.s32.totalorder %s888_s30, %s598_s18  ;;  %s692_s20 = smov [#allocation9]  }
  0x5d   : > { %v247_v10 = vsel %vm246_vm0, %v245_v7, 0.0  ;;  %v257_v11 = vmul.f32 0.8, %v256_v8  ;;  %s602_s4 = sshll.u32 %s692_s20, 4  ;;  %s603_s4 = int_to_ptr.vmem [resolvable:$false] %s602_s4 }
  0x5e   : > { %v248_v12 = vrot.slane %v247_v10, 4  ;;  %p600_p11 = pnand %p599_p0, %p948_p3  ;;  %s604_s27 = scalar_lea.vmem %s603_s4, 64 }
  0x5f   : > { %v258_v13 = vadd.f32 %v257_v11, %v255_v9  ;;  %p605_p7 = scmp.lt.s32.totalorder %s888_s30, %s603_s4  ;;  %p606_p10 = scmp.lt.s32.totalorder %s604_s27, %s598_s18 }
  0x60   : > { %v249_v14 = vadd.f32 %v248_v12, %v247_v10  ;;  %p601_p13 = pneg %p600_p11 }
  0x61   : > { %v259_v15 = vsel %vm246_vm0, %v258_v13, 0.0  ;;  %p607_p12 = por %p606_p10, %p605_p7 }
  0x62   : > { %v250_v16 = vrot.slane %v249_v14, 2  ;;  %v260_v17 = vrot.slane %v259_v15, 4 }
  0x63   : > { %p608_p9 = pnand %p607_p12, %p601_p13 }
  0x64   : > { %v251_v18 = vadd.f32 %v250_v16, %v249_v14  ;;  %v261_v19 = vadd.f32 %v260_v17, %v259_v15 }
  0x66   : > { %v252_v20 = vrot.slane %v251_v18, 1  ;;  %v262_v21 = vrot.slane %v261_v19, 2 }
  0x68   : > { %v253_v22 = vadd.f32 %v252_v20, %v251_v18  ;;  %v263_v23 = vadd.f32 %v262_v21, %v261_v19 }
  0x6a   : > { %v264_v24 = vrot.slane %v263_v23, 1  ;;  %270 = vst [vmem:[#allocation2] sm:$0x1] %v253_v22 }
  0x6c   : > { %v265_v25 = vadd.f32 %v264_v24, %v263_v23 }
  0x6e   : > { %271 = vst [vmem:[#allocation3] sm:$0x1] %v265_v25 }
  0x71   : > { %v285_v26 = vld [vmem:[#allocation2] sm:$0x1] }
  0x72   : > { %v287_v27 = vsel %vm286_vm1, %v285_v26, 0.0 }
  0x73   : > { %288 = vadd.xlane.f32.xlu0 %v287_v27 }
  0x75   : > { %v297_v28 = vld [vmem:[#allocation3] sm:$0x1] }
  0x76   : > { %v298_v29 = vsel %vm286_vm1, %v297_v28, 0.0 }
  0x77   : > { %299 = vadd.xlane.f32.xlu0 %v298_v29 }
 0x100   : > { %v289_v30 = vpop.xlane.xlu0 %288 }
 0x101   : > { %v290_v31 = vrot.slane %v289_v30, 4 }
 0x103   : > { %v291_v32 = vadd.f32 %v290_v31, %v289_v30 }
 0x104   : > { %v300_v33 = vpop.xlane.xlu0 %299 }
 0x105   : > { %v292_v34 = vrot.slane %v291_v32, 2  ;;  %v301_v35 = vrot.slane %v300_v33, 4 }
 0x107   : > { %v302_v36 = vadd.f32 %v301_v35, %v300_v33  ;;  %v293_v37 = vadd.f32 %v292_v34, %v291_v32 }
 0x109   : > { %v303_v38 = vrot.slane %v302_v36, 2  ;;  %v294_v39 = vrot.slane %v293_v37, 1 }
 0x10b   : > { %v304_v40 = vadd.f32 %v303_v38, %v302_v36  ;;  %v295_v41 = vadd.f32 %v294_v39, %v293_v37 }
 0x10d   : > { %463 = vpush %v295_v41  ;;  %v305_v42 = vrot.slane %v304_v40, 1 }
 0x10f   : > { %v306_v43 = vadd.f32 %v305_v42, %v304_v40 }
 0x111   : > { %465 = vpush %v306_v43 }
 0x13e   : > { %s464_s19 = spop %463 }
 0x13f   : > { %v311_v46 = vstv %s464_s19 }
 0x142   : > { %s466_s3 = spop %465 }
 0x143   : > { %v312_v47 = vstv %s466_s3 }
 0x144   : > { %v313_v48 = vsel %vm310_vm2, %v311_v46, %v312_v47 }
 0x145   : > { %314 = vst [vmem:[%s234_s26] sm:$0x3] %v313_v48 }
 0x146   : > { %611 = shalt.err (!%p608_p9)
}
 0x147   : > { %s612_s6 = scalar_lea.hbm %s886_s16, 32  ;;  %s616_s25 = scalar_lea.hbm %s937_s2, 64 }
 0x148   : > { %p613_p1 = scmp.ne.s32.totalorder %s886_s16, %s612_s6  ;;  %p617_p5 = scmp.lt.u32.totalorder %s886_s16, %s937_s2 }
 0x149   : > { %p618_p4 = scmp.lt.u32.totalorder %s616_s25, %s612_s6  ;;  %p620_p0 = scmp.lt.u32.totalorder %s612_s6, %s886_s16 }
 0x14a   : > { %p614_p6 = pnand %p613_p1, %p948_p3 }
 0x14b   : > { %p619_p8 = por %p618_p4, %p617_p5 }
 0x14c   : > { %p615_p2 = pneg %p614_p6 }
 0x14d   : > { %p621_p11 = por %p620_p0, %p619_p8 }
 0x14f   : > { %p622_p13 = pnand %p621_p11, %p615_p2 }
 0x151   : > { %625 = shalt.err (!%p622_p13)
}
 0x152   : > { %471 = dma.vmem_to_hbm [thread:$0]  (%p948_p3), %s888_s30, 32, %s886_s16, %s316_s12  }
 0x153 PF: > { %s342_s21 = sand.u32 1, %s664_s9   ;;  %p949_p7 = scmp.ne.s32.totalorder %s943_s24, 0 }
 0x154   : > { %p950_p10 = scmp.ge.s32.totalorder %s684_s14, 2  ;;  %s343_s19 = scalar_lea.sflag [#allocation6], %s342_s21 }
 0x156   : > { %p481_p12 = pnand %p950_p10, %p949_p7 }
 0x158   : > { %659 = dma.done.wait (!%p481_p12), %s343_s19, 32  }
 0x159   : > { %661 = vsyncadd (!%p481_p12), %s343_s19, 4294967264  ;;  %s21_s14 = sadd.s32 1, %s684_s14   ;;  %s951_s9 = smov %s668_s10 }
 0x15a   : > { %p18_p9 = scmp.ge.s32.totalorder %s21_s14, 4   ;;  %s952_s10 = smov %s672_s11 }
 0x15b   : > { %s953_s11 = smov %s764_s23  ;;  %s954_s12 = smov %s680_s13 }
 0x15c   : > { %s955_s13 = smov %s957_s17  ;;  %20 = sbr.rel (!%p18_p9) target bundleno = 8 (0x8), region = 100 }
 0x163   :  { %348 = vsyncpa [#allocation5], 1 }
 0x164   :  { %350 = vsyncpa [#allocation5 + $0x1], 1 }
 0x165   :  { %351 = vsyncpa [#allocation8], 1 }
 0x166   :  { %353 = vsyncpa [#allocation8 + $0x1], 1 }
 0x167   :  { %354 = vsyncpa [#allocation6], 1 }
 0x168   :  { %356 = vsyncpa [#allocation6 + $0x1], 1 }

</bundles_post_ra>
